<compile_context>
chip_gen: v6e
topology: v6e:2x2x1
jax: 0.10.0
libtpu: 0.0.40
codegen_flags: <defaults>
</compile_context>

<pallas_src>
import functools

import jax
import jax.numpy as jnp
from jax.experimental import pallas as pl
from jax.experimental.pallas import tpu as pltpu


def _mlp_kernel(x_ref, w1_ref, b1_ref, w2_ref, b2_ref, o_ref, *, dot_dtype):
    """Fused fc1 -> ReLU -> fc2 -> sigmoid on one (TB, In) batch tile."""
    x = x_ref[...]
    if x.dtype != dot_dtype:
        x = x.astype(dot_dtype)          # per-tile cast in VMEM (cheap; feeds MXU)

    # fc1 (MXU, f32 accumulate) + bias + ReLU (VPU, f32).
    h = jnp.dot(x, w1_ref[...], preferred_element_type=jnp.float32) + b1_ref[...]
    h = jnp.maximum(h, 0.0)
    if h.dtype != dot_dtype:
        h = h.astype(dot_dtype)

    # fc2 (MXU, f32 accumulate) + bias; epilogue stays f32.
    z = jnp.dot(h, w2_ref[...], preferred_element_type=jnp.float32) + b2_ref[...]

    # sigmoid(z) = 0.5 * tanh(0.5*z) + 0.5: one EUP op, exact (no approximate
    # reciprocal), no abs / select filler on the VPU.
    o_ref[...] = (0.5 * jnp.tanh(0.5 * z) + 0.5).astype(o_ref.dtype)


def neural_network_forward(x, w1, b1, w2, b2, *, batch_tile=2048, dot_dtype=None):
    """Forward pass of NeuralNetwork (fc1 -> ReLU -> fc2 -> sigmoid).

    x:  (B, In)  f32 activations
    w1: (In, H)  fc1 weight (transposed relative to torch.nn.Linear's (H, In))
    b1: (1, H)   fc1 bias
    w2: (H, Out) fc2 weight (transposed)
    b2: (1, Out) fc2 bias
    returns: (B, Out) f32
    """
    B, in_size = x.shape
    hidden = w1.shape[1]
    out_size = w2.shape[1]

    if dot_dtype is None:
        # bf16 MXU operands only pay off once the feature dims are MXU-sized;
        # at tiny H / Out keep everything f32.
        dot_dtype = jnp.bfloat16 if min(hidden, out_size) >= 128 else jnp.float32

    # Cast the (small, batch-invariant) weights once in the wrapper rather than
    # per grid step inside the kernel.  No-op for the f32 default.
    if w1.dtype != dot_dtype:
        w1 = w1.astype(dot_dtype)
    if w2.dtype != dot_dtype:
        w2 = w2.astype(dot_dtype)

    kernel = functools.partial(_mlp_kernel, dot_dtype=dot_dtype)

    if B <= batch_tile:
        # Tiny / single-tile case: no grid at all -- one invocation, whole
        # arrays resident in VMEM, no index_map / pipeline prologue.  This
        # regime is pure launch+DMA overhead, so grid machinery only adds
        # bookkeeping.
        return pl.pallas_call(
            kernel,
            out_shape=jax.ShapeDtypeStruct((B, out_size), jnp.float32),
            in_specs=[pl.BlockSpec(memory_space=pltpu.MemorySpace.VMEM)] * 5,
            out_specs=pl.BlockSpec(memory_space=pltpu.MemorySpace.VMEM),
        )(x, w1, b1, w2, b2)

    # ---------------- large-batch path: batch-tiled grid ----------------
    # Pick the batch tile: start from `batch_tile` (large, to amortize per-step
    # overhead) and walk down in multiples of 8 sublanes to a tile that divides
    # B exactly, so no activation-padding pass is needed.  Only if B has no
    # reasonable multiple-of-8 divisor do we pad the batch once (last resort).
    tb0 = max(8, (min(batch_tile, B) // 8) * 8)
    min_tb = 256
    tb = tb0
    while B % tb != 0 and tb > min_tb:
        tb -= 8
    if B % tb != 0:
        tb = tb0
        bp = pl.cdiv(B, tb) * tb
        x = jnp.pad(x, ((0, bp - B), (0, 0)))
        padded = True
    else:
        bp = B
        padded = False

    # Explicit VMEM budget: double-buffered activation tiles + resident weights
    # (double-buffered by default) + slack.  Scaled models that would not fit
    # (e.g. v7x's 64 MiB per-TC VMEM) fail loudly instead of silently spilling.
    wbytes = jnp.dtype(dot_dtype).itemsize
    est = (2 * tb * (in_size + out_size) * 4
           + 2 * (in_size * hidden + hidden * out_size) * wbytes
           + 2 * (hidden + out_size) * 4)
    vmem_limit = int(min(max(2 * est, 32 * 1024 * 1024), 64 * 1024 * 1024))

    out = pl.pallas_call(
        kernel,
        out_shape=jax.ShapeDtypeStruct((bp, out_size), jnp.float32),
        grid_spec=pltpu.PrefetchScalarGridSpec(
            num_scalar_prefetch=0,
            grid=(bp // tb,),
            in_specs=[
                # Batch-tiled activations (double-buffered by the pipeline).
                pl.BlockSpec((tb, in_size), lambda i: (i, 0)),
                # Weights / biases: full-extent blocks with constant index maps
                # -> fetched once, VMEM-resident across all batch tiles (never
                # re-DMA'd).  For scaled models (multi-MiB weights) add
                # pipeline_mode=pl.Buffered(1) to these specs and/or tile the
                # hidden dim on a second "arbitrary" grid axis with an f32
                # accumulator so the plan still fits v7x's 64 MiB VMEM.
                pl.BlockSpec((in_size, hidden), lambda i: (0, 0)),
                pl.BlockSpec((1, hidden), lambda i: (0, 0)),
                pl.BlockSpec((hidden, out_size), lambda i: (0, 0)),
                pl.BlockSpec((1, out_size), lambda i: (0, 0)),
            ],
            # Output at its true width: minimal HBM write bytes, no sigmoid work
            # on dead columns, no post-kernel column slice.
            out_specs=pl.BlockSpec((tb, out_size), lambda i: (i, 0)),
        ),
        compiler_params=pltpu.CompilerParams(
            # Batch tiles are independent -> shard across TensorCores.
            dimension_semantics=("parallel",),
            vmem_limit_bytes=vmem_limit,
        ),
    )(x, w1, b1, w2, b2)
    return out[:B] if padded else out


def reference_forward(x, w1, b1, w2, b2):
    h = jnp.maximum(
        jnp.dot(x, w1, precision=jax.lax.Precision.HIGHEST) + b1, 0.0)
    return jax.nn.sigmoid(
        jnp.dot(h, w2, precision=jax.lax.Precision.HIGHEST) + b2)


if __name__ == "__main__":
    # Small shapes consistent with the module: batch=8, input=16, hidden=32, output=8.
    batch, input_size, hidden_size, output_size = 8, 16, 32, 8

    key = jax.random.PRNGKey(0)
    kx, kw1, kb1, kw2, kb2, kxl = jax.random.split(key, 6)

    x = jax.random.normal(kx, (batch, input_size), dtype=jnp.float32)
    # PyTorch Linear computes y = x @ W.T + b with W of shape (out, in); the
    # weights are stored here already transposed as (in, out) for x @ W.
    w1 = jax.random.normal(kw1, (input_size, hidden_size), dtype=jnp.float32) * 0.1
    b1 = jax.random.normal(kb1, (1, hidden_size), dtype=jnp.float32) * 0.1
    w2 = jax.random.normal(kw2, (hidden_size, output_size), dtype=jnp.float32) * 0.1
    b2 = jax.random.normal(kb2, (1, output_size), dtype=jnp.float32) * 0.1

    # --- tiny-shape path (no grid: pure launch-overhead regime) ---
    out_small = jax.block_until_ready(neural_network_forward(x, w1, b1, w2, b2))
    ref_small = reference_forward(x, w1, b1, w2, b2)
    assert out_small.shape == (batch, output_size)
    assert jnp.allclose(out_small, ref_small, atol=1e-3, rtol=1e-3), \
        "small-batch mismatch vs reference"

    # --- scaled-batch path (batch-tiled grid, weights VMEM-resident,
    #     parallel batch axis, true-width output, no activation padding) ---
    big_batch = 8192
    xl = jax.random.normal(kxl, (big_batch, input_size), dtype=jnp.float32)
    out_big = jax.block_until_ready(neural_network_forward(xl, w1, b1, w2, b2))
    ref_big = reference_forward(xl, w1, b1, w2, b2)
    assert out_big.shape == (big_batch, output_size)
    assert jnp.allclose(out_big, ref_big, atol=1e-3, rtol=1e-3), \
        "large-batch mismatch vs reference"

    print("KERNEL_OK")
</pallas_src>

<mosaic_0001>
module attributes {stable_mosaic.version = 11 : i64} {
  func.func @_mlp_kernel(%arg0: memref<8x16xf32, #tpu.memory_space<vmem>>, %arg1: memref<16x32xf32, #tpu.memory_space<vmem>>, %arg2: memref<1x32xf32, #tpu.memory_space<vmem>>, %arg3: memref<32x8xf32, #tpu.memory_space<vmem>>, %arg4: memref<1x8xf32, #tpu.memory_space<vmem>>, %arg5: memref<8x8xf32, #tpu.memory_space<vmem>>) attributes {dimension_semantics = [], scalar_prefetch = 0 : i64, scratch_operands = 0 : i64, tpu.core_type = #tpu.core_type<tc>} {
    %c0 = arith.constant 0 : index
    %c0_0 = arith.constant 0 : index
    %0 = vector.load %arg0[%c0, %c0_0] : memref<8x16xf32, #tpu.memory_space<vmem>>, vector<8x16xf32>
    %c0_1 = arith.constant 0 : index
    %c0_2 = arith.constant 0 : index
    %1 = vector.load %arg1[%c0_1, %c0_2] : memref<16x32xf32, #tpu.memory_space<vmem>>, vector<16x32xf32>
    %cst = arith.constant dense<0.000000e+00> : vector<8x32xf32>
    %2 = tpu.matmul %0, %1, %cst {dimension_numbers = #tpu.dot_dimension_numbers<[1], [0], [0], [1], [0, 0, 1, 1], [], []>} : vector<8x16xf32>, vector<16x32xf32>, vector<8x32xf32> -> vector<8x32xf32>
    %c0_3 = arith.constant 0 : index
    %c0_4 = arith.constant 0 : index
    %3 = vector.load %arg2[%c0_3, %c0_4] : memref<1x32xf32, #tpu.memory_space<vmem>>, vector<1x32xf32>
    %4 = vector.broadcast %3 : vector<1x32xf32> to vector<8x32xf32>
    %5 = arith.addf %2, %4 : vector<8x32xf32>
    %cst_5 = arith.constant 0.000000e+00 : f32
    %6 = vector.broadcast %cst_5 : f32 to vector<8x32xf32>
    %7 = arith.maximumf %5, %6 : vector<8x32xf32>
    %c0_6 = arith.constant 0 : index
    %c0_7 = arith.constant 0 : index
    %8 = vector.load %arg3[%c0_6, %c0_7] : memref<32x8xf32, #tpu.memory_space<vmem>>, vector<32x8xf32>
    %cst_8 = arith.constant dense<0.000000e+00> : vector<8x8xf32>
    %9 = tpu.matmul %7, %8, %cst_8 {dimension_numbers = #tpu.dot_dimension_numbers<[1], [0], [0], [1], [0, 0, 1, 1], [], []>} : vector<8x32xf32>, vector<32x8xf32>, vector<8x8xf32> -> vector<8x8xf32>
    %c0_9 = arith.constant 0 : index
    %c0_10 = arith.constant 0 : index
    %10 = vector.load %arg4[%c0_9, %c0_10] : memref<1x8xf32, #tpu.memory_space<vmem>>, vector<1x8xf32>
    %11 = vector.broadcast %10 : vector<1x8xf32> to vector<8x8xf32>
    %12 = arith.addf %9, %11 : vector<8x8xf32>
    %cst_11 = arith.constant 5.000000e-01 : f32
    %13 = vector.broadcast %cst_11 : f32 to vector<8x8xf32>
    %14 = arith.mulf %13, %12 : vector<8x8xf32>
    %15 = math.tanh %14 : vector<8x8xf32>
    %cst_12 = arith.constant 5.000000e-01 : f32
    %16 = vector.broadcast %cst_12 : f32 to vector<8x8xf32>
    %17 = arith.mulf %16, %15 : vector<8x8xf32>
    %cst_13 = arith.constant 5.000000e-01 : f32
    %18 = vector.broadcast %cst_13 : f32 to vector<8x8xf32>
    %19 = arith.addf %17, %18 : vector<8x8xf32>
    %c0_14 = arith.constant 0 : index
    %c0_15 = arith.constant 0 : index
    %20 = vector.load %arg5[%c0_14, %c0_15] : memref<8x8xf32, #tpu.memory_space<vmem>>, vector<8x8xf32>
    tpu.vector_store %arg5[%c0_14, %c0_15], %19 {strides = array<i32>} : memref<8x8xf32, #tpu.memory_space<vmem>>, vector<8x8xf32>,
    return
  }
}

</mosaic_0001>

<bundles_post_ra>
// kernel: tpu_custom_call.1
= control target key start
LH: loop header
LB: loop body
LE: loop exit
PB: predicated region body
PF: predicated region fallthrough
CT: control target
= control target key end

     0   :  { %v268_v1 = vmov 0.0   ;;  %vm269_vm0 = vmmov 0   ;;  %s331_s0 = inlined_call_operand.vmem [shape: f32[8,16], index: 0, kind: input, shape index: {}]   ;;  %s332_s1 = inlined_call_operand.vmem [shape: f32[16,32], index: 1, kind: input, shape index: {}]   ;;  %s333_s2 = inlined_call_operand.vmem [shape: f32[1,32], index: 2, kind: input, shape index: {}]   ;;  %s334_s3 = inlined_call_operand.vmem [shape: f32[32,8], index: 3, kind: input, shape index: {}]   ;;  %s335_s4 = inlined_call_operand.vmem [shape: f32[1,8], index: 4, kind: input, shape index: {}]   ;;  %s336_s5 = inlined_call_operand.hbm [shape: f32[8,8], index: 5, kind: output, shape index: {}]  }
   0x1   :  { %v23_v0 = vld [vmem:[%s332_s1 + $0x8] sm:$0xff]  ;;  %223 = vmatprep.subr.mxu0 %v268_v1  ;;  %v22_v2 = vld [vmem:[%s332_s1] sm:$0xff]  ;;  %227 = vmatprep.mubr.msk.f32.mxu0 %vm269_vm0, %v268_v1  ;;  %v109_v3 = vld [vmem:[%s334_s3 + $0x18] sm:$0xff] }
   0x2   :  { %10 = vsyncpa [#allocation3], 0  ;;  %224 = vmatpush3.msra.mxu0 %v23_v0  ;;  %v21_v4 = vld [vmem:[%s331_s0] sm:$0xff]  ;;  %vm31_vm1 = vcmask 130048   ;;  %230 = vmatprep.subr.mxu1 %v268_v1  ;;  %v108_v5 = vld [vmem:[%s334_s3 + $0x10] sm:$0xff]  ;;  %vm117_vm2 = vcmask 261120  }
   0x3   :  { %225 = vmatprep.subr.mxu0 %v268_v1  ;;  %231 = vmatpush3.msra.mxu1 %v109_v3  ;;  %v107_v6 = vld [vmem:[%s334_s3 + $0x8] sm:$0xff]  ;;  %v106_v7 = vld [vmem:[%s334_s3] sm:$0xff]  ;;  %s270_s3 = smov [#allocation2]   ;;  %vm195_vm3 = vcmask 64512  }
   0x4   :  { %226 = vmatpush3.msra.mxu0 %v22_v2  ;;  %232 = vmatprep.subr.mxu1 %v268_v1  ;;  %v211_v8 = vld [vmem:[%s333_s2] ss:$0 sm:$0xff]  ;;  %s203_s9 = sshll.u32 %s270_s3, 4  ;;  %s204_s9 = int_to_ptr.vmem [resolvable:$true] %s203_s9 }
   0x5   :  { %228 = vmatmul.mubr.msk.f32.vlgmr.msra.gmra.mxu0 %vm31_vm1, %v21_v4  ;;  %238 = vmatprep.mubr.msk.f32.mxu1 %vm269_vm0, %v268_v1  ;;  %v213_v13 = vld [vmem:[%s335_s4] ss:$0 sm:$0xff]  ;;  %s246_s2 = scalar_lea.vmem %s204_s9, 128  ;;  %p251_p1 = scmp.lt.s32.totalorder %s204_s9, %s204_s9 }
   0x6   :  { %233 = vmatpush3.msra.mxu1 %v108_v5  ;;  %p247_p0 = scmp.ne.s32.totalorder %s204_s9, %s246_s2  ;;  %p252_p2 = scmp.lt.s32.totalorder %s246_s2, %s246_s2 }
   0x7   :  { %234 = vmatprep.subr.mxu1 %v268_v1 }
   0x8   :  { %235 = vmatpush3.msra.mxu1 %v107_v6  ;;  %p253_p3 = por %p252_p2, %p251_p1 }
   0x9   :  { %236 = vmatprep.subr.mxu1 %v268_v1 }
   0xa   :  { %237 = vmatpush3.msra.mxu1 %v106_v7  ;;  %p254_p4 = pnand %p253_p3, %p247_p0 }
  0xc5   :  { %v101_v9 = vpop.f32.mrf.mxu0 }
  0xc6   :  { %v102_v10 = vadd.f32 %v211_v8, %v101_v9 }
  0xc7   :  { %v229_v11 = vpop.f32.mrf.mxu0 }
  0xc8   :  { %v105_v12 = vmax.f32 %v102_v10, 0.0 }
  0xca   :  { %239 = vmatmul.mubr.msk.f32.vlgmr.msra.gmra.mxu1 %vm117_vm2, %v105_v12 }
 0x18a   :  { %v187_v14 = vpop.f32.mrf.mxu1 }
 0x18b   :  { %v188_v15 = vadd.f32 %v213_v13, %v187_v14 }
 0x18c   :  { %v240_v16 = vpop.f32.mrf.mxu1 }
 0x18d   :  { %v191_v17 = vmul.f32 0.5, %v188_v15 }
 0x18f   :  { %244 = vtanh.f32 %v191_v17 }
 0x19c   :  { %v245_v18 = vpop.eup %244 }
 0x19d   :  { %v193_v19 = vmul.f32 0.5, %v245_v18 }
 0x19f   :  { %v194_v20 = vadd.f32 0.5, %v193_v19 }
 0x1a1   :  { %196 = vst.msk [vmem:[#allocation2] sm:$0xff] %vm195_vm3, %v194_v20 }
 0x1a2   :  { %257 = shalt.err (!%p254_p4)
}
 0x1a3   :  { %206 = dma.vmem_to_hbm [thread:$0]  %s204_s9, 128, %s336_s5, [#allocation3]  }
 0x1a4   :  { %266 = dma.done.wait [#allocation3], 128  }
 0x1a5   :  { %267 = vsyncadd [#allocation3], 4294967168 }
 0x1a6   :  { %210 = vsyncpa [#allocation3], 1 }

</bundles_post_ra>
